<compile_context>
chip_gen: v5e
topology: v5e:2x2
jax: 0.10.0
libtpu: 0.0.40
codegen_flags: <defaults>
</compile_context>

<pallas_src>
import jax
import jax.numpy as jnp
from jax.experimental import pallas as pl
from jax.experimental.pallas import tpu as pltpu

INPUT_SIZE = 28 * 28   # 784
HIDDEN_SIZE = 32
OUTPUT_SIZE = 10


def fc_kernel(x_ref, w1_ref, b1_ref, w2_ref, b2_ref, o_ref):
    # fc1 + ReLU  (MXU matmul, f32 accumulate even for bf16-streamed x/w1)
    h = jnp.dot(x_ref[...], w1_ref[...], preferred_element_type=jnp.float32)
    h = jnp.maximum(h + b1_ref[...], 0.0)            # (TB, H) + (1, H)

    # fc2
    logits = jnp.dot(h, w2_ref[...], preferred_element_type=jnp.float32)
    logits = logits + b2_ref[...]                    # (TB, O) + (1, O)

    # softmax over dim=1 (feature axis), max-subtracted, exact divide
    # (kernel is HBM-bound -> the exact reciprocal is hidden under the x DMA)
    m = jnp.max(logits, axis=-1, keepdims=True)
    e = jnp.exp(logits - m)
    denom = jnp.sum(e, axis=-1, keepdims=True)
    o_ref[...] = (e / denom).astype(o_ref.dtype)


def _round_up(a, m):
    return ((a + m - 1) // m) * m


def fc_forward(x, w1, b1, w2, b2, *, tb=None):
    """x: (B, 1, 28, 28) or (B, 784), f32 or bf16 -> (B, 10) softmax probs (f32).

    x is streamed in the dtype it arrives in; to actually halve HBM traffic,
    hand in x already stored as bf16 (a cast here would cost an extra HBM
    pass, which is why this wrapper never casts x).  Only w1 (tiny, VMEM-
    resident) is cast to match x.  tb: target batch-tile size in rows.
    """
    x2 = x.reshape(-1, INPUT_SIZE)                   # glue: x.view(-1, 784)
    B = x2.shape[0]

    itemsize = jnp.dtype(x2.dtype).itemsize
    if x2.dtype != w1.dtype:
        w1 = w1.astype(x2.dtype)                     # tiny, one-time cast

    # Sublane packing: f32 -> 8 rows, bf16 -> 16, int8/fp8 -> 32.
    align = max(8, 32 // itemsize)
    if tb is None:
        tb = 2048 if itemsize >= 4 else 4096         # ~13 MiB double-buffered x

    b_aligned = _round_up(B, align)
    tb_eff = _round_up(min(tb, b_aligned), align)
    # Keep >= 2 grid tiles when the batch allows it so the "parallel" batch
    # axis shards across both v7x TensorCores (harmless on v5e/v6e).
    if b_aligned > align:
        tb_eff = min(tb_eff, _round_up(pl.cdiv(b_aligned, 2), align))
    nt = pl.cdiv(B, tb_eff)                          # ragged last tile allowed

    w1_bytes = w1.size * jnp.dtype(w1.dtype).itemsize
    param_bytes = w1_bytes + 4 * (b1.size + w2.size + b2.size)
    cost = pl.CostEstimate(
        flops=2 * B * (INPUT_SIZE * HIDDEN_SIZE + HIDDEN_SIZE * OUTPUT_SIZE),
        transcendentals=B * OUTPUT_SIZE,
        bytes_accessed=int(B * INPUT_SIZE * itemsize
                           + B * OUTPUT_SIZE * 4
                           + param_bytes),
    )

    out = pl.pallas_call(
        fc_kernel,
        out_shape=jax.ShapeDtypeStruct((B, OUTPUT_SIZE), jnp.float32),
        grid=(nt,),
        in_specs=[
            # x streams tile-by-tile over the batch axis (double-buffered DMA).
            pl.BlockSpec((tb_eff, INPUT_SIZE), lambda i: (i, 0)),
            # Parameters: same (full-array) block every step -> VMEM resident.
            pl.BlockSpec((INPUT_SIZE, HIDDEN_SIZE), lambda i: (0, 0)),
            pl.BlockSpec((1, HIDDEN_SIZE), lambda i: (0, 0)),
            pl.BlockSpec((HIDDEN_SIZE, OUTPUT_SIZE), lambda i: (0, 0)),
            pl.BlockSpec((1, OUTPUT_SIZE), lambda i: (0, 0)),
        ],
        out_specs=pl.BlockSpec((tb_eff, OUTPUT_SIZE), lambda i: (i, 0)),
        compiler_params=pltpu.CompilerParams(
            dimension_semantics=("parallel",),        # shards batch across TCs (v7x)
            vmem_limit_bytes=32 * 1024 * 1024,        # fits tb=2048 f32 / 4096 bf16,
        ),                                            #   within v7x's 64 MiB physical
        cost_estimate=cost,
    )(x2, w1, b1, w2, b2)

    return out


def xavier_uniform(key, fan_in, fan_out, dtype=jnp.float32):
    # matches torch.nn.init.xavier_uniform_ (gain=1)
    limit = jnp.sqrt(6.0 / (fan_in + fan_out))
    return jax.random.uniform(key, (fan_in, fan_out), dtype, -limit, limit)


def init_params(key):
    k1, k2 = jax.random.split(key)
    w1 = xavier_uniform(k1, INPUT_SIZE, HIDDEN_SIZE)   # (784, 32) = fc1.weight.T
    b1 = jnp.zeros((1, HIDDEN_SIZE), jnp.float32)
    w2 = xavier_uniform(k2, HIDDEN_SIZE, OUTPUT_SIZE)  # (32, 10)  = fc2.weight.T
    b2 = jnp.zeros((1, OUTPUT_SIZE), jnp.float32)
    return w1, b1, w2, b2


def _reference(x, w1, b1, w2, b2):
    xr = x.reshape(-1, INPUT_SIZE).astype(jnp.float32)
    h = jnp.maximum(xr @ w1.astype(jnp.float32) + b1, 0.0)
    return jax.nn.softmax(h @ w2 + b2, axis=1)


if __name__ == "__main__":
    key = jax.random.PRNGKey(0)
    k_x, k_x2, k_p = jax.random.split(key, 3)
    w1, b1, w2, b2 = init_params(k_p)

    # --- small MNIST-like batch: (B, C, H, W) = (2, 1, 28, 28), f32 --------
    x = jax.random.normal(k_x, (2, 1, 28, 28), jnp.float32)
    out = jax.block_until_ready(fc_forward(x, w1, b1, w2, b2))
    assert out.shape == (2, OUTPUT_SIZE)
    assert jnp.allclose(jnp.sum(out, axis=1), 1.0, atol=1e-5)
    ref = _reference(x, w1, b1, w2, b2)
    assert jnp.allclose(out, ref, atol=1e-5, rtol=1e-5)

    # --- ragged multi-tile path: B=272, tb=128 -> 3 tiles, last partial ----
    xb = jax.random.normal(k_x2, (272, 1, 28, 28), jnp.float32)
    outb = jax.block_until_ready(fc_forward(xb, w1, b1, w2, b2, tb=128))
    assert outb.shape == (272, OUTPUT_SIZE)
    refb = _reference(xb, w1, b1, w2, b2)
    assert jnp.allclose(jnp.sum(outb, axis=1), 1.0, atol=1e-5)
    assert jnp.allclose(outb, refb, atol=1e-5, rtol=1e-5)

    # --- bf16 streaming path: x already stored as bf16 upstream ------------
    xb16 = xb.astype(jnp.bfloat16)
    outb16 = jax.block_until_ready(fc_forward(xb16, w1, b1, w2, b2))
    assert outb16.shape == (272, OUTPUT_SIZE)
    refb16 = _reference(xb16, w1.astype(jnp.bfloat16), b1, w2, b2)
    assert jnp.allclose(jnp.sum(outb16, axis=1), 1.0, atol=1e-3)
    assert jnp.allclose(outb16, refb16, atol=3e-2, rtol=3e-2)

    print("KERNEL_OK")
</pallas_src>

<mosaic_0001>
module attributes {stable_mosaic.version = 11 : i64} {
  func.func @fc_kernel(%arg0: i32, %arg1: memref<8x784xf32, #tpu.memory_space<vmem>>, %arg2: memref<784x32xf32, #tpu.memory_space<vmem>>, %arg3: memref<1x32xf32, #tpu.memory_space<vmem>>, %arg4: memref<32x10xf32, #tpu.memory_space<vmem>>, %arg5: memref<1x10xf32, #tpu.memory_space<vmem>>, %arg6: memref<8x10xf32, #tpu.memory_space<vmem>>) attributes {dimension_semantics = [#tpu.dimension_semantics<parallel>], iteration_bounds = array<i64: 1>, scalar_prefetch = 0 : i64, scratch_operands = 0 : i64, tpu.core_type = #tpu.core_type<tc>, window_params = [{transform_indices = @transform_0, window_bounds = array<i64: 8, 784>}, {pipeline_mode = #tpu.pipeline_mode<synchronous>, transform_indices = @transform_1, window_bounds = array<i64: 784, 32>}, {pipeline_mode = #tpu.pipeline_mode<synchronous>, transform_indices = @transform_2, window_bounds = array<i64: 1, 32>}, {pipeline_mode = #tpu.pipeline_mode<synchronous>, transform_indices = @transform_3, window_bounds = array<i64: 32, 10>}, {pipeline_mode = #tpu.pipeline_mode<synchronous>, transform_indices = @transform_4, window_bounds = array<i64: 1, 10>}, {transform_indices = @transform_5, window_bounds = array<i64: 8, 10>}]} {
    %c0 = arith.constant 0 : index
    %c0_0 = arith.constant 0 : index
    %0 = vector.load %arg1[%c0, %c0_0] : memref<8x784xf32, #tpu.memory_space<vmem>>, vector<8x784xf32>
    %c0_1 = arith.constant 0 : index
    %c0_2 = arith.constant 0 : index
    %1 = vector.load %arg2[%c0_1, %c0_2] : memref<784x32xf32, #tpu.memory_space<vmem>>, vector<784x32xf32>
    %cst = arith.constant dense<0.000000e+00> : vector<8x32xf32>
    %2 = tpu.matmul %0, %1, %cst {dimension_numbers = #tpu.dot_dimension_numbers<[1], [0], [0], [1], [0, 0, 1, 1], [], []>} : vector<8x784xf32>, vector<784x32xf32>, vector<8x32xf32> -> vector<8x32xf32>
    %c0_3 = arith.constant 0 : index
    %c0_4 = arith.constant 0 : index
    %3 = vector.load %arg3[%c0_3, %c0_4] : memref<1x32xf32, #tpu.memory_space<vmem>>, vector<1x32xf32>
    %4 = vector.broadcast %3 : vector<1x32xf32> to vector<8x32xf32>
    %5 = arith.addf %2, %4 : vector<8x32xf32>
    %cst_5 = arith.constant 0.000000e+00 : f32
    %6 = vector.broadcast %cst_5 : f32 to vector<8x32xf32>
    %7 = arith.maximumf %5, %6 : vector<8x32xf32>
    %c0_6 = arith.constant 0 : index
    %c0_7 = arith.constant 0 : index
    %8 = vector.load %arg4[%c0_6, %c0_7] : memref<32x10xf32, #tpu.memory_space<vmem>>, vector<32x10xf32>
    %cst_8 = arith.constant dense<0.000000e+00> : vector<8x10xf32>
    %9 = tpu.matmul %7, %8, %cst_8 {dimension_numbers = #tpu.dot_dimension_numbers<[1], [0], [0], [1], [0, 0, 1, 1], [], []>} : vector<8x32xf32>, vector<32x10xf32>, vector<8x10xf32> -> vector<8x10xf32>
    %c0_9 = arith.constant 0 : index
    %c0_10 = arith.constant 0 : index
    %10 = vector.load %arg5[%c0_9, %c0_10] : memref<1x10xf32, #tpu.memory_space<vmem>>, vector<1x10xf32>
    %11 = vector.broadcast %10 : vector<1x10xf32> to vector<8x10xf32>
    %12 = arith.addf %9, %11 : vector<8x10xf32>
    %cst_11 = arith.constant dense<0xFF800000> : vector<8xf32>
    %13 = vector.multi_reduction <maximumf>, %12, %cst_11 [1] : vector<8x10xf32> to vector<8xf32>
    %14 = vector.shape_cast %13 : vector<8xf32> to vector<8x1xf32>
    %15 = vector.broadcast %14 : vector<8x1xf32> to vector<8x10xf32>
    %16 = arith.subf %12, %15 : vector<8x10xf32>
    %17 = math.exp %16 : vector<8x10xf32>
    %cst_12 = arith.constant dense<0.000000e+00> : vector<8xf32>
    %18 = vector.multi_reduction <add>, %17, %cst_12 [1] : vector<8x10xf32> to vector<8xf32>
    %19 = vector.shape_cast %18 : vector<8xf32> to vector<8x1xf32>
    %20 = vector.broadcast %19 : vector<8x1xf32> to vector<8x10xf32>
    %21 = arith.divf %17, %20 : vector<8x10xf32>
    %c0_13 = arith.constant 0 : index
    %c0_14 = arith.constant 0 : index
    %22 = vector.load %arg6[%c0_13, %c0_14] : memref<8x10xf32, #tpu.memory_space<vmem>>, vector<8x10xf32>
    tpu.vector_store %arg6[%c0_13, %c0_14], %21 {strides = array<i32>} : memref<8x10xf32, #tpu.memory_space<vmem>>, vector<8x10xf32>,
    return
  }
  func.func @transform_0(%arg0: i32) -> (i32, i32) {
    %c0_i32 = arith.constant 0 : i32
    %c0_i32_0 = arith.constant 0 : i32
    return %arg0, %c0_i32 : i32, i32
  }
  func.func @transform_1(%arg0: i32) -> (i32, i32) {
    %c0_i32 = arith.constant 0 : i32
    %c0_i32_0 = arith.constant 0 : i32
    %c0_i32_1 = arith.constant 0 : i32
    return %c0_i32, %c0_i32_0 : i32, i32
  }
  func.func @transform_2(%arg0: i32) -> (i32, i32) {
    %c0_i32 = arith.constant 0 : i32
    %c0_i32_0 = arith.constant 0 : i32
    %c0_i32_1 = arith.constant 0 : i32
    return %c0_i32, %c0_i32_0 : i32, i32
  }
  func.func @transform_3(%arg0: i32) -> (i32, i32) {
    %c0_i32 = arith.constant 0 : i32
    %c0_i32_0 = arith.constant 0 : i32
    %c0_i32_1 = arith.constant 0 : i32
    return %c0_i32, %c0_i32_0 : i32, i32
  }
  func.func @transform_4(%arg0: i32) -> (i32, i32) {
    %c0_i32 = arith.constant 0 : i32
    %c0_i32_0 = arith.constant 0 : i32
    %c0_i32_1 = arith.constant 0 : i32
    return %c0_i32, %c0_i32_0 : i32, i32
  }
  func.func @transform_5(%arg0: i32) -> (i32, i32) {
    %c0_i32 = arith.constant 0 : i32
    %c0_i32_0 = arith.constant 0 : i32
    return %arg0, %c0_i32 : i32, i32
  }
}

</mosaic_0001>

<bundles_post_ra>
// kernel: tpu_custom_call.1
= control target key start
LH: loop header
LB: loop body
LE: loop exit
PB: predicated region body
PF: predicated region fallthrough
CT: control target
= control target key end

     0   :  { %10 = vsyncpa [#allocation3], 0  ;;  %vm167_vm0 = vcmask 130048   ;;  %vm319_vm1 = vcmask 261120   ;;  %vm343_vm2 = vcmask 80896   ;;  %s799_s0 = inlined_call_operand.vmem [shape: f32[2,784], index: 0, kind: input, shape index: {}]   ;;  %s800_s1 = inlined_call_operand.vmem [shape: f32[784,32], index: 1, kind: input, shape index: {}]   ;;  %s801_s2 = inlined_call_operand.vmem [shape: f32[1,32], index: 2, kind: input, shape index: {}]   ;;  %s802_s3 = inlined_call_operand.vmem [shape: f32[32,10], index: 3, kind: input, shape index: {}]   ;;  %s803_s4 = inlined_call_operand.vmem [shape: f32[1,10], index: 4, kind: input, shape index: {}]   ;;  %s804_s5 = inlined_call_operand.hbm [shape: f32[2,10], index: 5, kind: output, shape index: {}]  }
   0x1   :  { %v44_v0 = vld [vmem:[%s800_s1 + $0x78] sm:$0xff]  ;;  %v43_v1 = vld [vmem:[%s800_s1 + $0x70] sm:$0xff]  ;;  %v42_v4 = vld [vmem:[%s800_s1 + $0x68] sm:$0xff] }
   0x2   :  { %170 = vmatpush.msra.mxu0 %v44_v0  ;;  %v60_v2 = vld [vmem:[%s800_s1 + $0xf8] sm:$0xff]  ;;  %v59_v3 = vld [vmem:[%s800_s1 + $0xf0] sm:$0xff]  ;;  %v58_v5 = vld [vmem:[%s800_s1 + $0xe8] sm:$0xff] }
   0x3   :  { %190 = vmatpush.msra.mxu1 %v60_v2  ;;  %v41_v6 = vld [vmem:[%s800_s1 + $0x60] sm:$0xff]  ;;  %v40_v8 = vld [vmem:[%s800_s1 + $0x58] sm:$0xff]  ;;  %v39_v11 = vld [vmem:[%s800_s1 + $0x50] sm:$0xff] }
   0x4   :  { %171 = vmatpush.msra.mxu0 %v43_v1  ;;  %v57_v7 = vld [vmem:[%s800_s1 + $0xe0] sm:$0xff]  ;;  %v56_v9 = vld [vmem:[%s800_s1 + $0xd8] sm:$0xff]  ;;  %v75_v12 = vld [vmem:[%s800_s1 + $0x170] sm:$0xff] }
   0x5   :  { %191 = vmatpush.msra.mxu1 %v59_v3  ;;  %v76_v10 = vld [vmem:[%s800_s1 + $0x178] sm:$0xff]  ;;  %v55_v14 = vld [vmem:[%s800_s1 + $0xd0] sm:$0xff]  ;;  %v74_v15 = vld [vmem:[%s800_s1 + $0x168] sm:$0xff] }
   0x6   :  { %172 = vmatpush.msra.mxu0 %v42_v4  ;;  %210 = vmatpush.msra.mxu2 %v76_v10  ;;  %v92_v13 = vld [vmem:[%s800_s1 + $0x1f8] sm:$0xff]  ;;  %v38_v16 = vld [vmem:[%s800_s1 + $0x48] sm:$0xff]  ;;  %v91_v17 = vld [vmem:[%s800_s1 + $0x1f0] sm:$0xff] }
   0x7   :  { %192 = vmatpush.msra.mxu1 %v58_v5  ;;  %230 = vmatpush.msra.mxu3 %v92_v13  ;;  %v54_v18 = vld [vmem:[%s800_s1 + $0xc8] sm:$0xff]  ;;  %v73_v19 = vld [vmem:[%s800_s1 + $0x160] sm:$0xff]  ;;  %v72_v24 = vld [vmem:[%s800_s1 + $0x158] sm:$0xff] }
   0x8   :  { %173 = vmatpush.msra.mxu0 %v41_v6  ;;  %211 = vmatpush.msra.mxu2 %v75_v12  ;;  %v90_v20 = vld [vmem:[%s800_s1 + $0x1e8] sm:$0xff]  ;;  %v37_v21 = vld [vmem:[%s800_s1 + $0x40] sm:$0xff]  ;;  %v36_v25 = vld [vmem:[%s800_s1 + $0x38] sm:$0xff] }
   0x9   :  { %193 = vmatpush.msra.mxu1 %v57_v7  ;;  %231 = vmatpush.msra.mxu3 %v91_v17  ;;  %v89_v22 = vld [vmem:[%s800_s1 + $0x1e0] sm:$0xff]  ;;  %v88_v26 = vld [vmem:[%s800_s1 + $0x1d8] sm:$0xff]  ;;  %v71_v28 = vld [vmem:[%s800_s1 + $0x150] sm:$0xff] }
   0xa   :  { %174 = vmatpush.msra.mxu0 %v40_v8  ;;  %212 = vmatpush.msra.mxu2 %v74_v15  ;;  %v53_v23 = vld [vmem:[%s800_s1 + $0xc0] sm:$0xff]  ;;  %v52_v27 = vld [vmem:[%s800_s1 + $0xb8] sm:$0xff]  ;;  %v35_v29 = vld [vmem:[%s800_s1 + $0x30] sm:$0xff] }
   0xb   :  { %194 = vmatpush.msra.mxu1 %v56_v9  ;;  %232 = vmatpush.msra.mxu3 %v90_v20  ;;  %v87_v30 = vld [vmem:[%s800_s1 + $0x1d0] sm:$0xff]  ;;  %v70_v32 = vld [vmem:[%s800_s1 + $0x148] sm:$0xff]  ;;  %v69_v36 = vld [vmem:[%s800_s1 + $0x140] sm:$0xff] }
   0xc   :  { %175 = vmatpush.msra.mxu0 %v39_v11  ;;  %213 = vmatpush.msra.mxu2 %v73_v19  ;;  %v51_v31 = vld [vmem:[%s800_s1 + $0xb0] sm:$0xff]  ;;  %v34_v33 = vld [vmem:[%s800_s1 + $0x28] sm:$0xff]  ;;  %v33_v37 = vld [vmem:[%s800_s1 + $0x20] sm:$0xff] }
   0xd   :  { %195 = vmatpush.msra.mxu1 %v55_v14  ;;  %233 = vmatpush.msra.mxu3 %v89_v22  ;;  %v86_v34 = vld [vmem:[%s800_s1 + $0x1c8] sm:$0xff]  ;;  %v85_v38 = vld [vmem:[%s800_s1 + $0x1c0] sm:$0xff]  ;;  %v68_v40 = vld [vmem:[%s800_s1 + $0x138] sm:$0xff] }
   0xe   :  { %176 = vmatpush.msra.mxu0 %v38_v16  ;;  %214 = vmatpush.msra.mxu2 %v72_v24  ;;  %v50_v35 = vld [vmem:[%s800_s1 + $0xa8] sm:$0xff]  ;;  %v49_v39 = vld [vmem:[%s800_s1 + $0xa0] sm:$0xff]  ;;  %v32_v41 = vld [vmem:[%s800_s1 + $0x18] sm:$0xff] }
   0xf   :  { %196 = vmatpush.msra.mxu1 %v54_v18  ;;  %234 = vmatpush.msra.mxu3 %v88_v26  ;;  %v84_v42 = vld [vmem:[%s800_s1 + $0x1b8] sm:$0xff]  ;;  %v67_v44 = vld [vmem:[%s800_s1 + $0x130] sm:$0xff]  ;;  %v66_v48 = vld [vmem:[%s800_s1 + $0x128] sm:$0xff] }
  0x10   :  { %177 = vmatpush.msra.mxu0 %v37_v21  ;;  %215 = vmatpush.msra.mxu2 %v71_v28  ;;  %v48_v43 = vld [vmem:[%s800_s1 + $0x98] sm:$0xff]  ;;  %v31_v45 = vld [vmem:[%s800_s1 + $0x10] sm:$0xff]  ;;  %v30_v49 = vld [vmem:[%s800_s1 + $0x8] sm:$0xff] }
  0x11   :  { %197 = vmatpush.msra.mxu1 %v53_v23  ;;  %235 = vmatpush.msra.mxu3 %v87_v30  ;;  %v83_v46 = vld [vmem:[%s800_s1 + $0x1b0] sm:$0xff]  ;;  %v29_v50 = vld [vmem:[%s800_s1] sm:$0xff]  ;;  %v82_v51 = vld [vmem:[%s800_s1 + $0x1a8] sm:$0xff] }
  0x12   :  { %178 = vmatpush.msra.mxu0 %v36_v25  ;;  %216 = vmatpush.msra.mxu2 %v70_v32  ;;  %v47_v47 = vld [vmem:[%s800_s1 + $0x90] sm:$0xff]  ;;  %v46_v52 = vld [vmem:[%s800_s1 + $0x88] sm:$0xff]  ;;  %v108_v53 = vld [vmem:[%s800_s1 + $0x278] sm:$0xff] }
  0x13   :  { %198 = vmatpush.msra.mxu1 %v52_v27  ;;  %236 = vmatpush.msra.mxu3 %v86_v34  ;;  %v65_v54 = vld [vmem:[%s800_s1 + $0x120] sm:$0xff]  ;;  %v23_v57 = vld [vmem:[%s799_s0 + $0xe] sm:$0xff]  ;;  %v124_v62 = vld [vmem:[%s800_s1 + $0x2f8] sm:$0xff] }
  0x14   :  { %179 = vmatpush.msra.mxu0 %v35_v29  ;;  %217 = vmatpush.msra.mxu2 %v69_v36  ;;  %v81_v55 = vld [vmem:[%s800_s1 + $0x1a0] sm:$0xff]  ;;  %v27_v60 = vld [vmem:[%s799_s0 + $0x2a] sm:$0xff]  ;;  %v64_v63 = vld [vmem:[%s800_s1 + $0x118] sm:$0xff]  ;;  %141 = vst [vmem:[#allocation1 + $0x1] ss:$4 sm:$0xff] %v23_v57 }
  0x15   :  { %199 = vmatpush.msra.mxu1 %v51_v31  ;;  %237 = vmatpush.msra.mxu3 %v85_v38  ;;  %v21_v56 = vld [vmem:[%s799_s0] sm:$0xff]  ;;  %v107_v61 = vld [vmem:[%s800_s1 + $0x270] sm:$0xff]  ;;  %v106_v0 = vld [vmem:[%s800_s1 + $0x268] sm:$0xff]  ;;  %145 = vst [vmem:[#allocation1 + $0x3] ss:$4 sm:$0xff] %v27_v60 }
  0x16   :  { %180 = vmatpush.msra.mxu0 %v34_v33  ;;  %218 = vmatpush.msra.mxu2 %v68_v40  ;;  %v45_v58 = vld [vmem:[%s800_s1 + $0x80] sm:$0xff]  ;;  %139 = vst [vmem:[#allocation1] ss:$4 sm:$0xff] %v21_v56  ;;  %v123_v1 = vld [vmem:[%s800_s1 + $0x2f0] sm:$0xff]  ;;  %v80_v2 = vld [vmem:[%s800_s1 + $0x198] sm:$0xff] }
  0x17   :  { %200 = vmatpush.msra.mxu1 %v50_v35  ;;  %238 = vmatpush.msra.mxu3 %v84_v42  ;;  %v25_v59 = vld [vmem:[%s799_s0 + $0x1c] sm:$0xff]  ;;  %v122_v3 = vld [vmem:[%s800_s1 + $0x2e8] sm:$0xff]  ;;  %v63_v4 = vld [vmem:[%s800_s1 + $0x110] sm:$0xff] }
  0x18   :  { %181 = vmatpush.msra.mxu0 %v33_v37  ;;  %219 = vmatpush.msra.mxu2 %v67_v44  ;;  %143 = vst [vmem:[#allocation1 + $0x2] ss:$4 sm:$0xff] %v25_v59  ;;  %v62_v5 = vld [vmem:[%s800_s1 + $0x108] sm:$0xff]  ;;  %v79_v6 = vld [vmem:[%s800_s1 + $0x190] sm:$0xff]  ;;  %v105_v11 = vld [vmem:[%s800_s1 + $0x260] sm:$0xff] }
  0x19   :  { %201 = vmatpush.msra.mxu1 %v49_v39  ;;  %239 = vmatpush.msra.mxu3 %v83_v46  ;;  %v22_v7 = vld [vmem:[%s799_s0 + $0x8] sm:$0x3f]  ;;  %v24_v8 = vld [vmem:[%s799_s0 + $0x16] sm:$0x3f]  ;;  %v121_v13 = vld [vmem:[%s800_s1 + $0x2e0] sm:$0xff] }
  0x1a   :  { %182 = vmatpush.msra.mxu0 %v32_v41  ;;  %220 = vmatpush.msra.mxu2 %v66_v48  ;;  %v26_v9 = vld [vmem:[%s799_s0 + $0x24] sm:$0x3f]  ;;  %v28_v10 = vld [vmem:[%s799_s0 + $0x32] sm:$0x3f]  ;;  %147 = vst [vmem:[#allocation1 + $0x20] ss:$4 sm:$0xff] %v22_v7 }
  0x1b   :  { %202 = vmatpush.msra.mxu1 %v48_v43  ;;  %240 = vmatpush.msra.mxu3 %v82_v51  ;;  %v78_v12 = vld [vmem:[%s800_s1 + $0x188] sm:$0xff]  ;;  %149 = vst [vmem:[#allocation1 + $0x21] ss:$4 sm:$0xff] %v24_v8  ;;  %v61_v14 = vld [vmem:[%s800_s1 + $0x100] sm:$0xff]  ;;  %v104_v15 = vld [vmem:[%s800_s1 + $0x258] sm:$0xff] }
  0x1c   :  { %183 = vmatpush.msra.mxu0 %v31_v45  ;;  %221 = vmatpush.msra.mxu2 %v65_v54  ;;  %151 = vst [vmem:[#allocation1 + $0x22] ss:$4 sm:$0xff] %v26_v9  ;;  %v120_v16 = vld [vmem:[%s800_s1 + $0x2d8] sm:$0xff]  ;;  %v126_v17 = vld [vmem:[%s800_s1 + $0x308] sm:$0xff]  ;;  %v103_v18 = vld [vmem:[%s800_s1 + $0x250] sm:$0xff] }
  0x1d   :  { %203 = vmatpush.msra.mxu1 %v47_v47  ;;  %241 = vmatpush.msra.mxu3 %v81_v55  ;;  %153 = vst [vmem:[#allocation1 + $0x23] ss:$4 sm:$0xff] %v28_v10  ;;  %v77_v20 = vld [vmem:[%s800_s1 + $0x180] sm:$0xff]  ;;  %v119_v21 = vld [vmem:[%s800_s1 + $0x2d0] sm:$0xff]  ;;  %v102_v23 = vld [vmem:[%s800_s1 + $0x248] sm:$0xff] }
  0x1e   :  { %184 = vmatpush.msra.mxu0 %v30_v49  ;;  %222 = vmatpush.msra.mxu2 %v64_v63  ;;  %v118_v25 = vld [vmem:[%s800_s1 + $0x2c8] sm:$0xff]  ;;  %v125_v26 = vld [vmem:[%s800_s1 + $0x300] sm:$0xff]  ;;  %v100_v30 = vld [vmem:[%s800_s1 + $0x238] sm:$0xff] }
  0x1f   :  { %204 = vmatpush.msra.mxu1 %v46_v52  ;;  %242 = vmatpush.msra.mxu3 %v80_v2  ;;  %v156_v19 = vld.sshfl [vmem:[#allocation1 + $0x10] sm:$0xff pattern:$0x73625140]  ;;  %v154_v22 = vld.sshfl [vmem:[#allocation1] sm:$0xff pattern:$0x73625140] }
  0x20   :  { %185 = vmatpush.msra.mxu0 %v29_v50  ;;  %223 = vmatpush.msra.mxu2 %v63_v4  ;;  %v157_v24 = vld.sshfl [vmem:[#allocation1 + $0x18] sm:$0xff pattern:$0x73625140]  ;;  %v101_v27 = vld [vmem:[%s800_s1 + $0x240] sm:$0xff]  ;;  %v99_v33 = vld [vmem:[%s800_s1 + $0x230] sm:$0xff] }
  0x21   :  { %205 = vmatpush.msra.mxu1 %v45_v58  ;;  %243 = vmatpush.msra.mxu3 %v79_v6  ;;  %v155_v28 = vld.sshfl [vmem:[#allocation1 + $0x8] sm:$0xff pattern:$0x73625140]  ;;  %v117_v29 = vld [vmem:[%s800_s1 + $0x2c0] sm:$0xff]  ;;  %v116_v32 = vld [vmem:[%s800_s1 + $0x2b8] sm:$0xff] }
  0x22   :  { %250 = vmatpush.msrb.mxu0 %v108_v53  ;;  %224 = vmatpush.msra.mxu2 %v62_v5  ;;  %v115_v34 = vld [vmem:[%s800_s1 + $0x2b0] sm:$0xff]  ;;  %v98_v35 = vld [vmem:[%s800_s1 + $0x228] sm:$0xff]  ;;  %v97_v37 = vld [vmem:[%s800_s1 + $0x220] sm:$0xff] }
  0x23   :  { %270 = vmatpush.msrb.mxu1 %v124_v62  ;;  %244 = vmatpush.msra.mxu3 %v78_v12  ;;  %v114_v36 = vld [vmem:[%s800_s1 + $0x2a8] sm:$0xff]  ;;  %v113_v38 = vld [vmem:[%s800_s1 + $0x2a0] sm:$0xff]  ;;  %v96_v39 = vld [vmem:[%s800_s1 + $0x218] sm:$0xff] }
  0x24   :  { %251 = vmatpush.msrb.mxu0 %v107_v61  ;;  %225 = vmatpush.msra.mxu2 %v61_v14  ;;  %v160_v31 = vld.sshfl [vmem:[#allocation1 + $0x30] sm:$0xff pattern:$0x73625140]  ;;  %v112_v40 = vld [vmem:[%s800_s1 + $0x298] sm:$0xff]  ;;  %v94_v43 = vld [vmem:[%s800_s1 + $0x208] sm:$0xff] }
  0x25   :  { %271 = vmatpush.msrb.mxu1 %v123_v1  ;;  %226 = vmatmul.f32.vlgmr.msra.gmra.mxu2 %v156_v19  ;;  %v95_v41 = vld [vmem:[%s800_s1 + $0x210] sm:$0xff]  ;;  %v110_v44 = vld [vmem:[%s800_s1 + $0x288] sm:$0xff]  ;;  %v93_v45 = vld [vmem:[%s800_s1 + $0x200] sm:$0xff] }
  0x26   :  { %252 = vmatpush.msrb.mxu0 %v106_v0  ;;  %304 = vmatpush.msrb.mxu2 %v126_v17  ;;  %v111_v42 = vld [vmem:[%s800_s1 + $0x290] sm:$0xff]  ;;  %v158_v46 = vld.sshfl [vmem:[#allocation1 + $0x20] sm:$0xff pattern:$0x73625140]  ;;  %v314_v49 = vld [vmem:[%s802_s3 + $0x18] sm:$0xff] }
  0x27   :  { %272 = vmatpush.msrb.mxu1 %v122_v3  ;;  %245 = vmatpush.msra.mxu3 %v77_v20  ;;  %v109_v47 = vld [vmem:[%s800_s1 + $0x280] sm:$0xff]  ;;  %v159_v48 = vld.sshfl [vmem:[#allocation1 + $0x28] sm:$0xff pattern:$0x73625140]  ;;  %v313_v50 = vld [vmem:[%s802_s3 + $0x10] sm:$0xff] }
  0x28   :  { %253 = vmatpush.msrb.mxu0 %v105_v11  ;;  %246 = vmatmul.f32.vlgmr.msra.gmra.mxu3 %v157_v24  ;;  %v312_v51 = vld [vmem:[%s802_s3 + $0x8] sm:$0xff]  ;;  %v311_v52 = vld [vmem:[%s802_s3] sm:$0xff] }
  0x29   :  { %273 = vmatpush.msrb.mxu1 %v121_v13  ;;  %186 = vmatmul.f32.vlgmr.msra.gmra.mxu0 %v154_v22  ;;  %v392_v53 = vld [vmem:[%s801_s2] ss:$0 sm:$0xff] }
  0x2a   :  { %254 = vmatpush.msrb.mxu0 %v104_v15  ;;  %305 = vmatpush.msrb.mxu2 %v125_v26  ;;  %v393_v5 = vld [vmem:[%s803_s4] ss:$0 sm:$0xff] }
  0x2b   :  { %274 = vmatpush.msrb.mxu1 %v120_v16  ;;  %335 = vmatpush.msrb.mxu3 %v314_v49 }
  0x2c   :  { %255 = vmatpush.msrb.mxu0 %v103_v18  ;;  %206 = vmatmul.f32.vlgmr.msra.gmra.mxu1 %v155_v28 }
  0x2d   :  { %275 = vmatpush.msrb.mxu1 %v119_v21  ;;  %387 = vmatmul.msk.f32.vlgmr.msrb.gmra.mxu2 %vm167_vm0, %v160_v31 }
  0x2e   :  { %256 = vmatpush.msrb.mxu0 %v102_v23  ;;  %336 = vmatpush.msrb.mxu3 %v313_v50 }
  0x2f   :  { %276 = vmatpush.msrb.mxu1 %v118_v25 }
  0x30   :  { %257 = vmatpush.msrb.mxu0 %v101_v27  ;;  %337 = vmatpush.msrb.mxu3 %v312_v51 }
  0x31   :  { %277 = vmatpush.msrb.mxu1 %v117_v29 }
  0x32   :  { %258 = vmatpush.msrb.mxu0 %v100_v30  ;;  %338 = vmatpush.msrb.mxu3 %v311_v52 }
  0x33   :  { %278 = vmatpush.msrb.mxu1 %v116_v32 }
  0x34   :  { %259 = vmatpush.msrb.mxu0 %v99_v33 }
  0x35   :  { %279 = vmatpush.msrb.mxu1 %v115_v34 }
  0x36   :  { %260 = vmatpush.msrb.mxu0 %v98_v35 }
  0x37   :  { %280 = vmatpush.msrb.mxu1 %v114_v36 }
  0x38   :  { %261 = vmatpush.msrb.mxu0 %v97_v37 }
  0x39   :  { %281 = vmatpush.msrb.mxu1 %v113_v38 }
  0x3a   :  { %262 = vmatpush.msrb.mxu0 %v96_v39 }
  0x3b   :  { %282 = vmatpush.msrb.mxu1 %v112_v40 }
  0x3c   :  { %263 = vmatpush.msrb.mxu0 %v95_v41 }
  0x3d   :  { %283 = vmatpush.msrb.mxu1 %v111_v42 }
  0x3e   :  { %264 = vmatpush.msrb.mxu0 %v94_v43 }
  0x3f   :  { %284 = vmatpush.msrb.mxu1 %v110_v44 }
  0x40   :  { %265 = vmatpush.msrb.mxu0 %v93_v45 }
  0x41   :  { %266 = vmatmul.f32.vlgmr.msrb.gmra.mxu0 %v158_v46  ;;  %285 = vmatpush.msrb.mxu1 %v109_v47 }
  0x42   :  { %286 = vmatmul.f32.vlgmr.msrb.gmra.mxu1 %v159_v48 }
  0xa6   :  { %v187_v54 = vpop.f32.mrf.mxu0 }
  0xa7   :  { %v188_v55 = vadd.f32 %v392_v53, %v187_v54 }
  0xa8   :  { %v227_v58 = vpop.f32.mrf.mxu2 }
  0xa9   :  { %v207_v56 = vpop.f32.mrf.mxu1 }
  0xaa   :  { %v208_v57 = vadd.f32 %v207_v56, %v188_v55 }
  0xab   :  { %v247_v60 = vpop.f32.mrf.mxu3 }
  0xac   :  { %v228_v59 = vadd.f32 %v227_v58, %v208_v57 }
  0xae   :  { %v248_v61 = vadd.f32 %v247_v60, %v228_v59 }
  0xb0   :  { %v307_v1 = vpop.f32.mrf.mxu2 }
  0xbe   :  { %v267_v62 = vpop.f32.mrf.mxu0 }
  0xbf   :  { %v268_v63 = vadd.f32 %v267_v62, %v248_v61  ;;  %v287_v0 = vpop.f32.mrf.mxu1 }
  0xc1   :  { %v288_v2 = vadd.f32 %v287_v0, %v268_v63 }
  0xc3   :  { %v308_v3 = vadd.f32 %v307_v1, %v288_v2 }
  0xc5   :  { %v310_v4 = vmax.f32 %v308_v3, 0.0 }
  0xc7   :  { %388 = vmatmul.msk.f32.vlgmr.msrb.gmra.mxu3 %vm319_vm1, %v310_v4 }
 0x14a   :  { %v340_v6 = vpop.f32.mrf.mxu3 }
 0x14b   :  { %v341_v7 = vadd.f32 %v393_v5, %v340_v6 }
 0x14d   :  { %v344_v8 = vsel %vm343_vm2, %v341_v7, -inf }
 0x14e   :  { %345 = vmax.xlane.f32.xlu0 %v344_v8 }
 0x1c1   :  { %v346_v9 = vpop.xlane.xlu0 %345 }
 0x1c2   :  { %v347_v10 = vsub.f32 %v341_v7, %v346_v9 }
 0x1c4   :  { %v348_v11 = vmul.f32 1.442695, %v347_v10 }
 0x1c6   :  { %394 = vpow2.f32 %v348_v11 }
 0x1cc   :  { %v395_v12 = vpop.eup %394 }
 0x1cd   :  { %v350_v13 = vsel %vm343_vm2, %v395_v12, 0.0 }
 0x1ce   :  { %351 = vadd.xlane.f32.xlu0 %v350_v13 }
 0x241   :  { %v352_v14 = vpop.xlane.xlu0 %351 }
 0x242   :  { %396 = vrcp.f32 %v352_v14  ;;  %v364_v18 = vand.u32 2147483648, %v352_v14  ;;  %v362_v20 = vand.u32 2147483647, %v352_v14  ;;  %vm358_vm4 = vweird.f32 %v352_v14 }
 0x244   :  { %v365_v22 = vor.u32 1.1754944e-38, %v364_v18  ;;  %vm363_vm6 = vcmp.eq.f32.partialorder %v362_v20, 8.507059e+37 }
 0x248   :  { %v397_v15 = vpop.eup %396 }
 0x249   :  { %v354_v16 = vmul.f32 %v397_v15, %v352_v14  ;;  %vm359_vm3 = vweird.f32 %v397_v15 }
 0x24a   :  { %vm360_vm5 = vmor %vm358_vm4, %vm359_vm3 }
 0x24b   :  { %v355_v17 = vsub.f32 1.0, %v354_v16 }
 0x24d   :  { %v356_v19 = vmul.f32 %v397_v15, %v355_v17 }
 0x24f   :  { %v357_v21 = vadd.f32 %v397_v15, %v356_v19 }
 0x251   :  { %v361_v23 = vsel %vm360_vm5, %v397_v15, %v357_v21 }
 0x252   :  { %v366_v24 = vsel %vm363_vm6, %v365_v22, %v361_v23 }
 0x253   :  { %v367_v25 = vmul.f32 %v395_v12, %v366_v24 }
 0x255   :  { %368 = vst.msk [vmem:[#allocation2] sm:$0xff] %vm343_vm2, %v367_v25 }
 0x256   :  { %372 = vsyncadd [#allocation3], 96  ;;  %s375_s12 = sshll.u32 %s804_s5, 4  ;;  %s424_s13 = smov [#allocation2]   ;;  %s376_s12 = int_to_ptr.hbm [resolvable:$true] %s375_s12 }
 0x257   :  { %s373_s14 = sshll.u32 %s424_s13, 4  ;;  %s425_s15 = smov 32   ;;  %s374_s14 = int_to_ptr.vmem [resolvable:$true] %s373_s14 }
 0x258   :  { %s426_s16 = smov 2  }
 0x259   :  { %381 = dma.vmem_to_hbm [thread:$0]  %s374_s14, 32, %s376_s12, [#allocation3], %s425_s15, %s425_s15, %s426_s16  }
 0x25a   :  { %422 = dma.done.wait [#allocation3], 128  }
 0x25b   :  { %423 = vsyncadd [#allocation3], 4294967168 }
 0x25c   :  { %386 = vsyncpa [#allocation3], 1 }

</bundles_post_ra>
